<compile_context>
chip_gen: v7x
topology: tpu7x:2x2x1
jax: 0.10.0
libtpu: 0.0.40
codegen_flags: <defaults>
</compile_context>

<pallas_src>
import functools
from typing import NamedTuple, Tuple

import jax
import jax.numpy as jnp
from jax.experimental import pallas as pl
from jax.experimental.pallas import tpu as pltpu


def _round_up(v, m):
    return (v + m - 1) // m * m


@functools.lru_cache(maxsize=1)
def _pick_vmem_limit():
    """Generation-aware scoped-VMEM limit with headroom (safe fallback 48 MiB)."""
    try:
        phys = pltpu.get_tpu_info().vmem_capacity_bytes
        # ~75% of physical, never above 96 MiB (v5e/v6e), never above 48 MiB on
        # 64 MiB-VMEM parts (v7x) — the min() below handles both.
        return int(min(phys * 3 // 4, 96 * 1024 * 1024))
    except Exception:
        return 48 * 1024 * 1024


class LinearPlan(NamedTuple):
    M: int
    K: int
    N: int
    tm: int
    tn: int
    tk: int
    M_p: int
    K_p: int
    N_p: int
    grid: Tuple[int, int, int]
    precast_x: bool


def plan_linear(M, K, N, *, tm=512, tn=512, tk=512):
    """Pick tile sizes / padded shapes once per (M, K, N) problem."""
    # tm multiple of 16 (bf16 packs 2 rows per sublane), tn/tk multiples of 128.
    # The 512 defaults are multiples of 256, matching the v6e/v7x 256x256 MXU.
    tm = min(tm, _round_up(M, 16))
    tn = min(tn, _round_up(N, 128))
    tk = min(tk, _round_up(K, 128))

    M_p = _round_up(M, tm)
    N_p = _round_up(N, tn)
    K_p = _round_up(K, tk)

    gM, gN, gK = M_p // tm, N_p // tn, K_p // tk

    # Megacore / v7x 2-TC: if both parallel axes are degenerate, split N so the
    # second TensorCore gets work (only when it stays (8,128)-aligned).
    if gM == 1 and gN == 1 and N_p >= 256 and (N_p // 2) % 128 == 0:
        tn = N_p // 2
        gN = 2

    # Pre-casting x to bf16 is a separate HBM pass (read 4B, write 2B per elem);
    # it only pays off when x is re-streamed across several N blocks.
    precast_x = gN >= 3

    return LinearPlan(M, K, N, tm, tn, tk, M_p, K_p, N_p, (gM, gN, gK), precast_x)


def prepare_linear_params(weight, bias, plan):
    """One-time (parameter-load-time) prep: pad, transpose to (K, N), cast bf16.

    weight: (N, K) f32 (PyTorch layout), bias: (N,) f32.
    Returns (w_t_p: (K_p, N_p) bf16, b_p: (1, N_p) f32).
    """
    N, K = weight.shape
    assert N == plan.N and K == plan.K, "weight shape does not match plan"

    if plan.N_p != N or plan.K_p != K:
        weight = jnp.pad(weight, ((0, plan.N_p - N), (0, plan.K_p - K)))
    w_t_p = jnp.transpose(weight).astype(jnp.bfloat16)          # (K_p, N_p)

    if plan.N_p != N:
        bias = jnp.pad(bias, (0, plan.N_p - N))
    b_p = bias.reshape(1, plan.N_p).astype(jnp.float32)
    return w_t_p, b_p


def _linear_kernel(x_ref, w_ref, b_ref, o_ref):
    # x_ref : (tm, tk)  f32 or bf16  activation tile
    # w_ref : (tk, tn)  bf16         pre-transposed weight tile
    # b_ref : (1,  tn)  f32          bias tile
    # o_ref : (tm, tn)  f32          output tile, resident across the K axis
    k = pl.program_id(2)

    @pl.when(k == 0)
    def _init():
        # Seed the resident output block with the bias (f32 epilogue).
        o_ref[...] = jnp.broadcast_to(b_ref[...], o_ref.shape)

    # Cast is a no-op if x was already pre-cast to bf16 in the wrapper.
    o_ref[...] += jnp.dot(
        x_ref[...].astype(jnp.bfloat16),
        w_ref[...],
        preferred_element_type=jnp.float32,
    )


def linear_pallas(x, w_t_p, b_p, plan, *, vmem_limit_bytes=None):
    """y = x @ W^T + b with W pre-prepared by prepare_linear_params."""
    M, K = x.shape
    assert M == plan.M and K == plan.K, "x shape does not match plan"

    if plan.M_p != M or plan.K_p != K:
        x = jnp.pad(x, ((0, plan.M_p - M), (0, plan.K_p - K)))
    if plan.precast_x:
        x = x.astype(jnp.bfloat16)

    tm, tn, tk = plan.tm, plan.tn, plan.tk
    gM, gN, gK = plan.grid

    x_bytes = plan.M_p * plan.K_p * x.dtype.itemsize * gN   # x re-streamed per N block
    w_bytes = plan.K_p * plan.N_p * 2 * gM                   # W re-streamed per M block
    b_bytes = plan.N_p * 4 * gM
    o_bytes = plan.M_p * plan.N_p * 4                        # single writeback per (i, j)

    out_p = pl.pallas_call(
        _linear_kernel,
        out_shape=jax.ShapeDtypeStruct((plan.M_p, plan.N_p), jnp.float32),
        grid_spec=pl.GridSpec(
            grid=plan.grid,
            in_specs=[
                pl.BlockSpec((tm, tk), lambda i, j, k: (i, k)),   # x
                pl.BlockSpec((tk, tn), lambda i, j, k: (k, j)),   # W^T (K, N)
                pl.BlockSpec((1, tn), lambda i, j, k: (0, j)),    # bias
            ],
            out_specs=pl.BlockSpec((tm, tn), lambda i, j, k: (i, j)),
        ),
        compiler_params=pltpu.CompilerParams(
            dimension_semantics=("parallel", "parallel", "arbitrary"),
            vmem_limit_bytes=(vmem_limit_bytes
                              if vmem_limit_bytes is not None
                              else _pick_vmem_limit()),
        ),
        cost_estimate=pl.CostEstimate(
            flops=2 * plan.M_p * plan.N_p * plan.K_p,
            transcendentals=0,
            bytes_accessed=x_bytes + w_bytes + b_bytes + o_bytes,
        ),
    )(x, w_t_p, b_p)

    return out_p[:plan.M, :plan.N]


if __name__ == "__main__":
    # Small shapes consistent with the module: batch=8, input_size=32, output_size=16
    batch, input_size, output_size = 8, 32, 16

    key = jax.random.PRNGKey(0)
    kx, kw, kb = jax.random.split(key, 3)

    # Deterministic init mimicking nn.Linear's default U(-1/sqrt(in), 1/sqrt(in))
    bound = 1.0 / (input_size ** 0.5)
    weight = jax.random.uniform(kw, (output_size, input_size),
                                minval=-bound, maxval=bound, dtype=jnp.float32)
    bias = jax.random.uniform(kb, (output_size,),
                              minval=-bound, maxval=bound, dtype=jnp.float32)
    x = jax.random.normal(kx, (batch, input_size), dtype=jnp.float32)

    # One-time parameter prep (pad + transpose + bf16), then the forward pass.
    plan = plan_linear(batch, input_size, output_size)
    w_t_p, b_p = prepare_linear_params(weight, bias, plan)

    out = linear_pallas(x, w_t_p, b_p, plan)
    jax.block_until_ready(out)

    assert out.shape == (batch, output_size)

    # Loose check vs the exact f32 reference (MXU inputs are bf16-rounded).
    ref_f32 = x @ weight.T + bias
    assert jnp.allclose(out, ref_f32, atol=2e-2, rtol=2e-2), "mismatch vs f32 reference"

    # Tight check vs a reference that also rounds inputs to bf16.
    ref_bf16 = (x.astype(jnp.bfloat16).astype(jnp.float32)
                @ weight.astype(jnp.bfloat16).astype(jnp.float32).T + bias)
    assert jnp.allclose(out, ref_bf16, atol=1e-4, rtol=1e-4), "mismatch vs bf16 reference"

    print("KERNEL_OK")
</pallas_src>

<mosaic_0001>
module attributes {stable_mosaic.version = 11 : i64} {
  func.func @_linear_kernel(%arg0: i32, %arg1: i32, %arg2: i32, %arg3: memref<16x128xf32, #tpu.memory_space<vmem>>, %arg4: memref<128x128xbf16, #tpu.memory_space<vmem>>, %arg5: memref<1x128xf32, #tpu.memory_space<vmem>>, %arg6: memref<16x128xf32, #tpu.memory_space<vmem>>) attributes {dimension_semantics = [#tpu.dimension_semantics<parallel>, #tpu.dimension_semantics<parallel>, #tpu.dimension_semantics<arbitrary>], iteration_bounds = array<i64: 1, 1, 1>, scalar_prefetch = 0 : i64, scratch_operands = 0 : i64, tpu.core_type = #tpu.core_type<tc>, window_params = [{transform_indices = @transform_0, window_bounds = array<i64: 16, 128>}, {transform_indices = @transform_1, window_bounds = array<i64: 128, 128>}, {transform_indices = @transform_2, window_bounds = array<i64: 1, 128>}, {transform_indices = @transform_3, window_bounds = array<i64: 16, 128>}]} {
    %c0_i32 = arith.constant 0 : i32
    %0 = arith.cmpi eq, %arg2, %c0_i32 : i32
    %1 = arith.extui %0 : i1 to i32
    %c0_i32_0 = arith.constant 0 : i32
    %2 = arith.cmpi ne, %1, %c0_i32_0 : i32
    scf.if %2 {
      %c0_8 = arith.constant 0 : index
      %c0_9 = arith.constant 0 : index
      %10 = vector.load %arg5[%c0_8, %c0_9] : memref<1x128xf32, #tpu.memory_space<vmem>>, vector<1x128xf32>
      %11 = vector.shape_cast %10 : vector<1x128xf32> to vector<1x128xf32>
      %12 = vector.broadcast %11 : vector<1x128xf32> to vector<16x128xf32>
      %c0_10 = arith.constant 0 : index
      %c0_11 = arith.constant 0 : index
      %13 = vector.load %arg6[%c0_10, %c0_11] : memref<16x128xf32, #tpu.memory_space<vmem>>, vector<16x128xf32>
      tpu.vector_store %arg6[%c0_10, %c0_11], %12 {strides = array<i32>} : memref<16x128xf32, #tpu.memory_space<vmem>>, vector<16x128xf32>,
    } else {
    }
    %c0 = arith.constant 0 : index
    %c0_1 = arith.constant 0 : index
    %3 = vector.load %arg6[%c0, %c0_1] : memref<16x128xf32, #tpu.memory_space<vmem>>, vector<16x128xf32>
    %c0_2 = arith.constant 0 : index
    %c0_3 = arith.constant 0 : index
    %4 = vector.load %arg3[%c0_2, %c0_3] : memref<16x128xf32, #tpu.memory_space<vmem>>, vector<16x128xf32>
    %5 = arith.truncf %4 : vector<16x128xf32> to vector<16x128xbf16>
    %c0_4 = arith.constant 0 : index
    %c0_5 = arith.constant 0 : index
    %6 = vector.load %arg4[%c0_4, %c0_5] : memref<128x128xbf16, #tpu.memory_space<vmem>>, vector<128x128xbf16>
    %cst = arith.constant dense<0.000000e+00> : vector<16x128xf32>
    %7 = tpu.matmul %5, %6, %cst {dimension_numbers = #tpu.dot_dimension_numbers<[1], [0], [0], [1], [0, 0, 1, 1], [], []>} : vector<16x128xbf16>, vector<128x128xbf16>, vector<16x128xf32> -> vector<16x128xf32>
    %8 = arith.addf %3, %7 : vector<16x128xf32>
    %c0_6 = arith.constant 0 : index
    %c0_7 = arith.constant 0 : index
    %9 = vector.load %arg6[%c0_6, %c0_7] : memref<16x128xf32, #tpu.memory_space<vmem>>, vector<16x128xf32>
    tpu.vector_store %arg6[%c0_6, %c0_7], %8 {strides = array<i32>} : memref<16x128xf32, #tpu.memory_space<vmem>>, vector<16x128xf32>,
    return
  }
  func.func @transform_0(%arg0: i32, %arg1: i32, %arg2: i32) -> (i32, i32) {
    %c0_i32 = arith.constant 0 : i32
    return %arg0, %arg2 : i32, i32
  }
  func.func @transform_1(%arg0: i32, %arg1: i32, %arg2: i32) -> (i32, i32) {
    %c0_i32 = arith.constant 0 : i32
    return %arg2, %arg1 : i32, i32
  }
  func.func @transform_2(%arg0: i32, %arg1: i32, %arg2: i32) -> (i32, i32) {
    %c0_i32 = arith.constant 0 : i32
    %c0_i32_0 = arith.constant 0 : i32
    return %c0_i32, %arg1 : i32, i32
  }
  func.func @transform_3(%arg0: i32, %arg1: i32, %arg2: i32) -> (i32, i32) {
    %c0_i32 = arith.constant 0 : i32
    return %arg0, %arg1 : i32, i32
  }
}

</mosaic_0001>

<bundles_post_ra>
// kernel: tpu_custom_call.1
= control target key start
LH: loop header
LB: loop body
LE: loop exit
PB: predicated region body
PF: predicated region fallthrough
CT: control target
= control target key end

     0   :  { %8 = vsyncpa [#allocation3], 0  ;;  %s390_s0 = inlined_call_operand.hbm [shape: f32[16,128], index: 0, kind: input, shape index: {}]   ;;  %s391_s1 = inlined_call_operand.hbm [shape: bf16[128,128], index: 1, kind: input, shape index: {}]   ;;  %s392_s2 = inlined_call_operand.vmem [shape: f32[1,128], index: 2, kind: input, shape index: {}]   ;;  %s393_s3 = inlined_call_operand.hbm [shape: f32[16,128], index: 3, kind: output, shape index: {}]  }
   0x1   :  { %9 = vsyncpa [#allocation6], 0 }
   0x2   :  { %10 = vsyncpa [#allocation4], 0  ;;  %s316_s12 = smov [#allocation2]   ;;  %s244_s16 = scalar_lea.hbm %s390_s0, 256 }
   0x3   :  { %s16_s13 = sshll.u32 %s316_s12, 4  ;;  %p245_p0 = scmp.ne.s32.totalorder %s390_s0, %s244_s16  ;;  %s17_s13 = int_to_ptr.vmem [resolvable:$true] %s16_s13 }
   0x4   :  { %p248_p1 = scmp.lt.u32.totalorder %s244_s16, %s390_s0 }
   0x6   :  { %p250_p2 = pnand %p248_p1, %p245_p0 }
   0x8   :  { %253 = shalt.err (!%p250_p2)
}
   0x9   :  { %s254_s21 = scalar_lea.vmem %s17_s13, 256  ;;  %p259_p4 = scmp.lt.s32.totalorder %s17_s13, %s17_s13 }
   0xa   :  { %p255_p3 = scmp.ne.s32.totalorder %s17_s13, %s254_s21  ;;  %p260_p5 = scmp.lt.s32.totalorder %s254_s21, %s254_s21 }
   0xc   :  { %p261_p6 = por %p260_p5, %p259_p4 }
   0xe   :  { %p262_p7 = pnand %p261_p6, %p255_p3 }
  0x10   :  { %265 = shalt.err (!%p262_p7)
}
  0x11   :  { %s317_s22 = smov 128   ;;  %s318_s23 = smov 8  }
  0x12   :  { %22 = dma.hbm_to_vmem [thread:$0]  %s390_s0, 256, %s17_s13, [#allocation3], %s317_s22, %s317_s22, %s318_s23  }
  0x13   :  { %s319_s26 = smov [#allocation5]   ;;  %s266_s30 = scalar_lea.hbm %s391_s1, 1024 }
  0x14   :  { %s28_s27 = sshll.u32 %s319_s26, 4  ;;  %p267_p8 = scmp.ne.s32.totalorder %s391_s1, %s266_s30  ;;  %s29_s27 = int_to_ptr.vmem [resolvable:$true] %s28_s27 }
  0x15   :  { %p270_p9 = scmp.lt.u32.totalorder %s266_s30, %s391_s1 }
  0x17   :  { %p272_p10 = pnand %p270_p9, %p267_p8 }
  0x19   :  { %275 = shalt.err (!%p272_p10)
}
  0x1a   :  { %s276_s8 = scalar_lea.vmem %s29_s27, 1024  ;;  %p281_p12 = scmp.lt.s32.totalorder %s29_s27, %s29_s27 }
  0x1b   :  { %p277_p11 = scmp.ne.s32.totalorder %s29_s27, %s276_s8  ;;  %p282_p13 = scmp.lt.s32.totalorder %s276_s8, %s276_s8 }
  0x1d   :  { %p283_p0 = por %p282_p13, %p281_p12 }
  0x1f   :  { %p284_p1 = pnand %p283_p0, %p277_p11 }
  0x21   :  { %287 = shalt.err (!%p284_p1)
}
  0x22   :  { %s320_s0 = smov 64   ;;  %s321_s9 = smov 4  }
  0x23   :  { %34 = dma.hbm_to_vmem [thread:$0]  %s391_s1, 1024, %s29_s27, [#allocation6], %s320_s0, %s320_s0, %s321_s9  }
  0x24   :  { %310 = dma.done.wait [#allocation3], 256  }
  0x25   :  { %311 = vsyncadd [#allocation3], 4294967040 }
  0x26   :  { %312 = dma.done.wait [#allocation6], 1024  }
  0x27   :  { %313 = vsyncadd [#allocation6], 4294966272  ;;  %v322_v0 = vmov 0.0   ;;  %vm323_vm0 = vmmov 0   ;;  %v236_v1 = vld [vmem:[#allocation5] sm:$0xff]   ;;  %v237_v2 = vld [vmem:[#allocation5 + $0x8] sm:$0xff]  }
  0x28   :  { %207 = vmatprep.subr.bf16.mxu0 %v322_v0  ;;  %223 = vmatprep.mubr.msk.bf16.mxu0 %vm323_vm0, %v322_v0  ;;  %v238_v3 = vld [vmem:[#allocation5 + $0x10] sm:$0xff]   ;;  %v239_v4 = vld [vmem:[#allocation5 + $0x18] sm:$0xff]   ;;  %v240_v5 = vld [vmem:[#allocation5 + $0x20] sm:$0xff]   ;;  %s324_s13 = smov [#allocation7]  }
  0x29   :  { %208 = vmatpush3.bf16.msra.mxu0 %v236_v1  ;;  %v241_v6 = vld [vmem:[#allocation5 + $0x28] sm:$0xff]   ;;  %v242_v7 = vld [vmem:[#allocation5 + $0x30] sm:$0xff]   ;;  %v243_v8 = vld [vmem:[#allocation5 + $0x38] sm:$0xff]   ;;  %s176_s14 = sshll.u32 %s324_s13, 4  ;;  %s177_s14 = int_to_ptr.vmem [resolvable:$true] %s176_s14 }
  0x2a   :  { %209 = vmatprep.subr.bf16.mxu0 %v322_v0  ;;  %v59_v9 = vld [vmem:[#allocation2] sm:$0xff]  ;;  %v60_v10 = vld [vmem:[#allocation2 + $0x8] sm:$0xff]  ;;  %s288_s15 = scalar_lea.vmem %s177_s14, 256  ;;  %p293_p3 = scmp.lt.s32.totalorder %s177_s14, %s177_s14 }
  0x2b   :  { %v61_v11 = vpack.c.bf16 %v60_v10, %v59_v9  ;;  %v189_v12 = vld [vmem:[%s392_s2] ss:$0 sm:$0xff]  ;;  %p289_p2 = scmp.ne.s32.totalorder %s177_s14, %s288_s15  ;;  %p294_p4 = scmp.lt.s32.totalorder %s288_s15, %s288_s15 }
  0x2d   :  { %210 = vmatpush3.bf16.msra.mxu0 %v237_v2  ;;  %p295_p5 = por %p294_p4, %p293_p3 }
  0x2e   :  { %211 = vmatprep.subr.bf16.mxu0 %v322_v0 }
  0x2f   :  { %p296_p6 = pnand %p295_p5, %p289_p2 }
  0x31   :  { %212 = vmatpush3.bf16.msra.mxu0 %v238_v3 }
  0x32   :  { %213 = vmatprep.subr.bf16.mxu0 %v322_v0 }
  0x35   :  { %214 = vmatpush3.bf16.msra.mxu0 %v239_v4 }
  0x36   :  { %215 = vmatprep.subr.bf16.mxu0 %v322_v0 }
  0x39   :  { %216 = vmatpush3.bf16.msra.mxu0 %v240_v5 }
  0x3a   :  { %217 = vmatprep.subr.bf16.mxu0 %v322_v0 }
  0x3d   :  { %218 = vmatpush3.bf16.msra.mxu0 %v241_v6 }
  0x3e   :  { %219 = vmatprep.subr.bf16.mxu0 %v322_v0 }
  0x41   :  { %220 = vmatpush3.bf16.msra.mxu0 %v242_v7 }
  0x42   :  { %221 = vmatprep.subr.bf16.mxu0 %v322_v0 }
  0x45   :  { %222 = vmatpush3.bf16.msra.mxu0 %v243_v8 }
  0x48   :  { %224 = vmatmul.mubr.bf16.vlgmr.msra.gmra.mrb[0].mxu0 %v61_v11 }
 0x11b   :  { %v160_v13 = vpop.f32.mrb[0].mxu0 }
 0x11c   :  { %v167_v14 = vadd.f32 %v189_v12, %v160_v13  ;;  %v225_v15 = vpop.f32.mrb[1].mxu0 }
 0x11d   :  { %v163_v16 = vpop.f32.mrb[2].mxu0 }
 0x11e   :  { %169 = vst [vmem:[#allocation7] sm:$0xff] %v167_v14  ;;  %v168_v17 = vadd.f32 %v189_v12, %v163_v16  ;;  %v226_v18 = vpop.f32.mrb[3].mxu0 }
 0x120   :  { %170 = vst [vmem:[#allocation7 + $0x8] sm:$0xff] %v168_v17 }
 0x121   :  { %299 = shalt.err (!%p296_p6)
}
 0x122   :  { %s300_s17 = scalar_lea.hbm %s393_s3, 256 }
 0x123   :  { %p301_p7 = scmp.ne.s32.totalorder %s393_s3, %s300_s17  ;;  %p304_p8 = scmp.lt.u32.totalorder %s300_s17, %s393_s3 }
 0x125   :  { %p306_p9 = pnand %p304_p8, %p301_p7 }
 0x127   :  { %309 = shalt.err (!%p306_p9)
}
 0x128   :  { %182 = dma.vmem_to_hbm [thread:$0]  %s177_s14, 256, %s393_s3, [#allocation4], %s317_s22, %s317_s22, %s318_s23  }
 0x129   :  { %314 = dma.done.wait [#allocation4], 256  }
 0x12a   :  { %315 = vsyncadd [#allocation4], 4294967040 }
 0x12b   :  { %186 = vsyncpa [#allocation3], 1 }
 0x12c   :  { %187 = vsyncpa [#allocation6], 1 }
 0x12d   :  { %188 = vsyncpa [#allocation4], 1 }

</bundles_post_ra>
